<compile_context>
chip_gen: v7x
topology: tpu7x:2x2x1
jax: 0.10.0
libtpu: 0.0.40
codegen_flags: <defaults>
</compile_context>

<pallas_src>
import functools

import jax
import jax.numpy as jnp
from jax.experimental import pallas as pl
from jax.experimental.pallas import tpu as pltpu


def _hist_loss_kernel(pred_ref, tgt_ref, o_ref, acc_ref, *,
                      scale, n_rows, tile_n, blocks_per_split):
    split = pl.program_id(0)    # batch half ("parallel" axis, one per TC on v7x)
    step = pl.program_id(1)     # block within the half ("arbitrary" axis)

    @pl.when(step == 0)
    def _init():
        acc_ref[...] = jnp.zeros_like(acc_ref)

    pred = pred_ref[...].astype(jnp.float32)   # (tile_n, C)
    tgt = tgt_ref[...].astype(jnp.float32)     # (tile_n, C)

    # Rows past the true batch size (ragged last tile, or a whole duplicate
    # tile when num_blocks is odd) are masked instead of wrapper-side padding
    # -> no extra HBM pass over the inputs.
    block_start = (split * blocks_per_split + step) * tile_n
    row_ids = block_start + jax.lax.broadcasted_iota(jnp.int32, (tile_n, 1), 0)
    valid = row_ids < n_rows

    # log_softmax row constants: log_p = pred - m - log(denom).
    m = jnp.max(pred, axis=1, keepdims=True)                    # (tile_n, 1)
    denom = jnp.sum(jnp.exp(pred - m), axis=1, keepdims=True)   # (tile_n, 1)
    log_denom = jnp.log(denom)

    # Work on the raw target; fold the normalization into per-row scalars:
    #   KL_row = (1/S) * sum_c tgt*(log tgt - pred) - log S + m + log denom
    # with S = sum_c tgt and the xlogy convention tgt*log(tgt) == 0 at tgt==0.
    s = jnp.sum(tgt, axis=1, keepdims=True)
    s_safe = jnp.where(valid, s, 1.0)                # guard masked/garbage rows
    safe_tgt = jnp.where(tgt > 0.0, tgt, 1.0)
    row_partial = jnp.sum(tgt * (jnp.log(safe_tgt) - pred), axis=1,
                          keepdims=True)
    inv_s = pl.reciprocal(s_safe)                    # exact (approx=False)
    row_kl = inv_s * row_partial - jnp.log(s_safe) + m + log_denom

    # Wide accumulator: carried dependency is one VPU add per step; the
    # cross-sublane reduce happens only once per split, in finalize.
    acc_ref[...] += jnp.where(valid, row_kl, 0.0)

    @pl.when(step == pl.num_programs(1) - 1)
    def _finalize():
        total = jnp.sum(acc_ref[...]) * jnp.float32(scale)
        o_ref[...] = total.reshape(1, 1, 1)


def hist_loss(pred, target, lambda_s=1.0, tile_n=None):
    """Pallas TPU implementation of HistLoss.forward(pred, target)."""
    assert pred.shape == target.shape and pred.ndim == 2
    n, c = pred.shape

    # Tiny-batch fallback only: fewer than 8 rows cannot form a legal sublane
    # tile, so pad to 8 (the pad rows are masked in-kernel -> zero KL).  For
    # n >= 8 no wrapper-side pad is ever issued.
    if n < 8:
        pad = 8 - n
        pred = jnp.pad(pred, ((0, pad), (0, 0)))
        target = jnp.pad(target, ((0, pad), (0, 0)))
    n_rows_stored = max(n, 8)

    rows_cap = (n_rows_stored // 8) * 8   # keep tile <= array (tail is masked)
    if tile_n is None:
        # ~2 MiB per f32 input block: large DMAs near the HBM roofline while
        # 2 inputs x 2 pipeline buffers + temporaries stay comfortably inside
        # v7x's 64 MiB per-core VMEM (and v5e/v6e's 128 MiB).
        budget_rows = max(8, (2 * 1024 * 1024) // (c * 4))
        tile_n = min(2048, budget_rows)
    tile_n = max(8, (int(tile_n) // 8) * 8)
    tile_n = min(tile_n, rows_cap)

    num_blocks = -(-n_rows_stored // tile_n)
    # Leading "parallel" axis: on v7x each TensorCore processes one half of
    # the batch blocks and writes its own partial sum; on 1-TC chips this is
    # just a sequential loop (worst case one duplicate, fully-masked tile when
    # num_blocks is odd).
    num_splits = 2 if num_blocks >= 2 else 1
    blocks_per_split = -(-num_blocks // num_splits)

    def in_map(sp, i):
        # Clamp virtual out-of-range blocks (odd num_blocks) to a valid block;
        # the kernel masks them out entirely via the global row index.
        return (jnp.minimum(sp * blocks_per_split + i, num_blocks - 1), 0)

    kernel = functools.partial(
        _hist_loss_kernel,
        scale=float(lambda_s) / float(n),
        n_rows=n, tile_n=tile_n, blocks_per_split=blocks_per_split)

    itemsize = jnp.dtype(pred.dtype).itemsize
    out = pl.pallas_call(
        kernel,
        out_shape=jax.ShapeDtypeStruct((num_splits, 1, 1), jnp.float32),
        grid_spec=pltpu.PrefetchScalarGridSpec(
            num_scalar_prefetch=0,
            grid=(num_splits, blocks_per_split),
            in_specs=[
                pl.BlockSpec((tile_n, c), in_map),
                pl.BlockSpec((tile_n, c), in_map),
            ],
            out_specs=pl.BlockSpec((1, 1, 1), lambda sp, i: (sp, 0, 0)),
            scratch_shapes=[pltpu.VMEM((tile_n, 1), jnp.float32)],
        ),
        compiler_params=pltpu.CompilerParams(
            dimension_semantics=("parallel", "arbitrary"),
            vmem_limit_bytes=48 * 1024 * 1024,
        ),
        cost_estimate=pl.CostEstimate(
            flops=int(7 * n * c),
            transcendentals=int(2 * n * c),
            bytes_accessed=int(2 * n * c * itemsize + 8),
        ),
    )(pred, target)
    return jnp.sum(out)


def _hist_loss_ref(pred, target, lambda_s):
    """Pure-JAX reference mirroring the PyTorch semantics."""
    p = jax.nn.softmax(pred.astype(jnp.float32), axis=1)
    t = target.astype(jnp.float32)
    t = t / jnp.sum(t, axis=1, keepdims=True)
    log_p = jnp.log(p)
    kl = jnp.where(t > 0, t * jnp.log(jnp.where(t > 0, t, 1.0)), 0.0) - t * log_p
    return jnp.sum(kl) / pred.shape[0] * lambda_s


if __name__ == "__main__":
    key = jax.random.PRNGKey(0)
    k1, k2, k3, k4, k5, k6 = jax.random.split(key, 6)

    lambda_s = 0.5

    # Case 1: small (batch, bins) histogram, single grid step.
    N, C = 8, 128
    pred = jax.random.normal(k1, (N, C), dtype=jnp.float32)
    target = jax.random.uniform(k2, (N, C), dtype=jnp.float32) + 0.1

    loss = hist_loss(pred, target, lambda_s)
    jax.block_until_ready(loss)
    ref = _hist_loss_ref(pred, target, lambda_s)
    assert jnp.allclose(loss, ref, rtol=1e-5, atol=1e-5), (loss, ref)

    # Case 2: batch not a multiple of the tile -> exercises the 2-way split,
    # multi-step accumulation, the in-kernel ragged-tail mask and the
    # fully-masked duplicate tile (num_blocks odd).
    N2, C2 = 20, 128
    pred2 = jax.random.normal(k3, (N2, C2), dtype=jnp.float32)
    target2 = jax.random.uniform(k4, (N2, C2), dtype=jnp.float32) + 0.1

    loss2 = hist_loss(pred2, target2, lambda_s, tile_n=8)
    jax.block_until_ready(loss2)
    ref2 = _hist_loss_ref(pred2, target2, lambda_s)
    assert jnp.allclose(loss2, ref2, rtol=1e-5, atol=1e-5), (loss2, ref2)

    # Case 3: tiny batch (< 8 rows) and a bin count that is not a multiple of
    # 128 -> exercises the tiny-batch pad fallback and full-lane-dim blocks.
    N3, C3 = 4, 96
    pred3 = jax.random.normal(k5, (N3, C3), dtype=jnp.float32)
    target3 = jax.random.uniform(k6, (N3, C3), dtype=jnp.float32) + 0.1

    loss3 = hist_loss(pred3, target3, lambda_s)
    jax.block_until_ready(loss3)
    ref3 = _hist_loss_ref(pred3, target3, lambda_s)
    assert jnp.allclose(loss3, ref3, rtol=1e-5, atol=1e-5), (loss3, ref3)

    print("KERNEL_OK")
</pallas_src>

<mosaic_0001>
module attributes {stable_mosaic.version = 11 : i64} {
  func.func @_hist_loss_kernel(%arg0: i32, %arg1: i32, %arg2: memref<8x128xf32, #tpu.memory_space<vmem>>, %arg3: memref<8x128xf32, #tpu.memory_space<vmem>>, %arg4: memref<1x1x1xf32, #tpu.memory_space<vmem>>, %arg5: memref<8x1xf32, #tpu.memory_space<vmem>>) attributes {dimension_semantics = [#tpu.dimension_semantics<parallel>, #tpu.dimension_semantics<arbitrary>], iteration_bounds = array<i64: 1, 1>, scalar_prefetch = 0 : i64, scratch_operands = 1 : i64, tpu.core_type = #tpu.core_type<tc>, window_params = [{transform_indices = @transform_0, window_bounds = array<i64: 8, 128>}, {transform_indices = @transform_1, window_bounds = array<i64: 8, 128>}, {transform_indices = @transform_2, window_bounds = array<i64: 1, 1, 1>}]} {
    %c0_i32 = arith.constant 0 : i32
    %0 = arith.cmpi eq, %arg1, %c0_i32 : i32
    %1 = arith.extui %0 : i1 to i32
    %c0_i32_0 = arith.constant 0 : i32
    %2 = arith.cmpi ne, %1, %c0_i32_0 : i32
    scf.if %2 {
      %cst_18 = arith.constant 0.000000e+00 : f32
      %48 = vector.broadcast %cst_18 : f32 to vector<8x1xf32>
      %c0_19 = arith.constant 0 : index
      %c0_20 = arith.constant 0 : index
      %49 = vector.load %arg5[%c0_19, %c0_20] : memref<8x1xf32, #tpu.memory_space<vmem>>, vector<8x1xf32>
      tpu.vector_store %arg5[%c0_19, %c0_20], %48 {strides = array<i32>} : memref<8x1xf32, #tpu.memory_space<vmem>>, vector<8x1xf32>,
    } else {
    }
    %c0 = arith.constant 0 : index
    %c0_1 = arith.constant 0 : index
    %3 = vector.load %arg2[%c0, %c0_1] : memref<8x128xf32, #tpu.memory_space<vmem>>, vector<8x128xf32>
    %c0_2 = arith.constant 0 : index
    %c0_3 = arith.constant 0 : index
    %4 = vector.load %arg3[%c0_2, %c0_3] : memref<8x128xf32, #tpu.memory_space<vmem>>, vector<8x128xf32>
    %c1_i32 = arith.constant 1 : i32
    %5 = arith.muli %arg0, %c1_i32 : i32
    %6 = arith.addi %5, %arg1 : i32
    %c8_i32 = arith.constant 8 : i32
    %7 = arith.muli %6, %c8_i32 : i32
    %8 = tpu.iota {dimensions = array<i32: 0>} : vector<8x1xi32>
    %9 = vector.broadcast %7 : i32 to vector<8x1xi32>
    %10 = arith.addi %9, %8 : vector<8x1xi32>
    %c8_i32_4 = arith.constant 8 : i32
    %11 = vector.broadcast %c8_i32_4 : i32 to vector<8x1xi32>
    %12 = arith.cmpi slt, %10, %11 : vector<8x1xi32>
    %cst = arith.constant dense<0xFF800000> : vector<8xf32>
    %13 = vector.multi_reduction <maximumf>, %3, %cst [1] : vector<8x128xf32> to vector<8xf32>
    %14 = vector.shape_cast %13 : vector<8xf32> to vector<8x1xf32>
    %15 = vector.broadcast %14 : vector<8x1xf32> to vector<8x128xf32>
    %16 = arith.subf %3, %15 : vector<8x128xf32>
    %17 = math.exp %16 : vector<8x128xf32>
    %cst_5 = arith.constant dense<0.000000e+00> : vector<8xf32>
    %18 = vector.multi_reduction <add>, %17, %cst_5 [1] : vector<8x128xf32> to vector<8xf32>
    %19 = vector.shape_cast %18 : vector<8xf32> to vector<8x1xf32>
    %20 = math.log %19 : vector<8x1xf32>
    %cst_6 = arith.constant dense<0.000000e+00> : vector<8xf32>
    %21 = vector.multi_reduction <add>, %4, %cst_6 [1] : vector<8x128xf32> to vector<8xf32>
    %22 = vector.shape_cast %21 : vector<8xf32> to vector<8x1xf32>
    %cst_7 = arith.constant 1.000000e+00 : f32
    %23 = vector.broadcast %cst_7 : f32 to vector<8x1xf32>
    %24 = arith.select %12, %22, %23 : vector<8x1xi1>, vector<8x1xf32>
    %cst_8 = arith.constant 0.000000e+00 : f32
    %25 = vector.broadcast %cst_8 : f32 to vector<8x128xf32>
    %26 = arith.cmpf ogt, %4, %25 : vector<8x128xf32>
    %cst_9 = arith.constant 1.000000e+00 : f32
    %27 = vector.broadcast %cst_9 : f32 to vector<8x128xf32>
    %28 = arith.select %26, %4, %27 : vector<8x128xi1>, vector<8x128xf32>
    %29 = math.log %28 : vector<8x128xf32>
    %30 = arith.subf %29, %3 : vector<8x128xf32>
    %31 = arith.mulf %4, %30 : vector<8x128xf32>
    %cst_10 = arith.constant dense<0.000000e+00> : vector<8xf32>
    %32 = vector.multi_reduction <add>, %31, %cst_10 [1] : vector<8x128xf32> to vector<8xf32>
    %33 = vector.shape_cast %32 : vector<8xf32> to vector<8x1xf32>
    %34 = tpu.reciprocal %24 : vector<8x1xf32> -> vector<8x1xf32>
    %35 = arith.mulf %34, %33 : vector<8x1xf32>
    %36 = math.log %24 : vector<8x1xf32>
    %37 = arith.subf %35, %36 : vector<8x1xf32>
    %38 = arith.addf %37, %14 : vector<8x1xf32>
    %39 = arith.addf %38, %20 : vector<8x1xf32>
    %c0_11 = arith.constant 0 : index
    %c0_12 = arith.constant 0 : index
    %40 = vector.load %arg5[%c0_11, %c0_12] : memref<8x1xf32, #tpu.memory_space<vmem>>, vector<8x1xf32>
    %cst_13 = arith.constant 0.000000e+00 : f32
    %41 = vector.broadcast %cst_13 : f32 to vector<8x1xf32>
    %42 = arith.select %12, %39, %41 : vector<8x1xi1>, vector<8x1xf32>
    %43 = arith.addf %40, %42 : vector<8x1xf32>
    %c0_14 = arith.constant 0 : index
    %c0_15 = arith.constant 0 : index
    %44 = vector.load %arg5[%c0_14, %c0_15] : memref<8x1xf32, #tpu.memory_space<vmem>>, vector<8x1xf32>
    tpu.vector_store %arg5[%c0_14, %c0_15], %43 {strides = array<i32>} : memref<8x1xf32, #tpu.memory_space<vmem>>, vector<8x1xf32>,
    %c0_i32_16 = arith.constant 0 : i32
    %45 = arith.cmpi eq, %arg1, %c0_i32_16 : i32
    %46 = arith.extui %45 : i1 to i32
    %c0_i32_17 = arith.constant 0 : i32
    %47 = arith.cmpi ne, %46, %c0_i32_17 : i32
    scf.if %47 {
      %c0_18 = arith.constant 0 : index
      %c0_19 = arith.constant 0 : index
      %48 = vector.load %arg5[%c0_18, %c0_19] : memref<8x1xf32, #tpu.memory_space<vmem>>, vector<8x1xf32>
      %49 = vector.shape_cast %48 : vector<8x1xf32> to vector<1x8x1xf32>
      %cst_20 = arith.constant dense<0.000000e+00> : vector<1xf32>
      %50 = vector.multi_reduction <add>, %49, %cst_20 [1, 2] : vector<1x8x1xf32> to vector<1xf32>
      %51 = vector.shape_cast %50 : vector<1xf32> to vector<1x1x1xf32>
      %52 = vector.extract %51[0, 0, 0] : f32 from vector<1x1x1xf32>
      %cst_21 = arith.constant 6.250000e-02 : f32
      %53 = arith.mulf %52, %cst_21 : f32
      %54 = vector.broadcast %53 : f32 to vector<1x1x1xf32>
      %c0_22 = arith.constant 0 : index
      %c0_23 = arith.constant 0 : index
      %c0_24 = arith.constant 0 : index
      %55 = vector.load %arg4[%c0_22, %c0_23, %c0_24] : memref<1x1x1xf32, #tpu.memory_space<vmem>>, vector<1x1x1xf32>
      tpu.vector_store %arg4[%c0_22, %c0_23, %c0_24], %54 {strides = array<i32>} : memref<1x1x1xf32, #tpu.memory_space<vmem>>, vector<1x1x1xf32>,
    } else {
    }
    return
  }
  func.func @transform_0(%arg0: i32, %arg1: i32) -> (i32, i32) {
    %c1_i32 = arith.constant 1 : i32
    %0 = arith.muli %arg0, %c1_i32 : i32
    %1 = arith.addi %0, %arg1 : i32
    %c0_i32 = arith.constant 0 : i32
    %2 = arith.minsi %1, %c0_i32 : i32
    %c0_i32_0 = arith.constant 0 : i32
    %c0_i32_1 = arith.constant 0 : i32
    return %2, %c0_i32_0 : i32, i32
  }
  func.func @transform_1(%arg0: i32, %arg1: i32) -> (i32, i32) {
    %c1_i32 = arith.constant 1 : i32
    %0 = arith.muli %arg0, %c1_i32 : i32
    %1 = arith.addi %0, %arg1 : i32
    %c0_i32 = arith.constant 0 : i32
    %2 = arith.minsi %1, %c0_i32 : i32
    %c0_i32_0 = arith.constant 0 : i32
    %c0_i32_1 = arith.constant 0 : i32
    return %2, %c0_i32_0 : i32, i32
  }
  func.func @transform_2(%arg0: i32, %arg1: i32) -> (i32, i32, i32) {
    %c0_i32 = arith.constant 0 : i32
    %c0_i32_0 = arith.constant 0 : i32
    %c0_i32_1 = arith.constant 0 : i32
    return %arg0, %c0_i32, %c0_i32_0 : i32, i32, i32
  }
}

</mosaic_0001>

<bundles_post_ra>
// kernel: tpu_custom_call.1
= control target key start
LH: loop header
LB: loop body
LE: loop exit
PB: predicated region body
PF: predicated region fallthrough
CT: control target
= control target key end

     0   :  { %7 = vsyncpa [#allocation4], 0  ;;  %s283_s0 = inlined_call_operand.hbm [shape: f32[8,128], index: 0, kind: input, shape index: {}]   ;;  %s284_s1 = inlined_call_operand.hbm [shape: f32[8,128], index: 1, kind: input, shape index: {}]   ;;  %s285_s2 = inlined_call_operand.hbm [shape: f32[1,1,1], index: 2, kind: output, shape index: {}]  }
   0x1   :  { %8 = vsyncpa [#allocation7], 0 }
   0x2   :  { %9 = vsyncpa [#allocation5], 0  ;;  %s225_s9 = smov [#allocation3]   ;;  %s226_s11 = smov [#allocation6]  }
   0x3   :  { %s21_s10 = sshll.u32 %s225_s9, 4  ;;  %s36_s12 = sshll.u32 %s226_s11, 4  ;;  %s22_s10 = int_to_ptr.vmem [resolvable:$true] %s21_s10  ;;  %s37_s12 = int_to_ptr.vmem [resolvable:$true] %s36_s12 }
   0x4   :  { %s153_s15 = scalar_lea.hbm %s283_s0, 128 }
   0x5   :  { %p154_p0 = scmp.ne.s32.totalorder %s283_s0, %s153_s15  ;;  %p157_p1 = scmp.lt.u32.totalorder %s153_s15, %s283_s0 }
   0x7   :  { %p159_p2 = pnand %p157_p1, %p154_p0 }
   0x9   :  { %162 = shalt.err (!%p159_p2)
}
   0xa   :  { %s163_s20 = scalar_lea.vmem %s22_s10, 128  ;;  %p168_p4 = scmp.lt.s32.totalorder %s22_s10, %s22_s10 }
   0xb   :  { %p164_p3 = scmp.ne.s32.totalorder %s22_s10, %s163_s20  ;;  %p169_p5 = scmp.lt.s32.totalorder %s163_s20, %s163_s20 }
   0xd   :  { %p170_p6 = por %p169_p5, %p168_p4 }
   0xf   :  { %p171_p7 = pnand %p170_p6, %p164_p3 }
  0x11   :  { %174 = shalt.err (!%p171_p7)
}
  0x12   :  { %24 = dma.hbm_to_vmem [thread:$0]  %s283_s0, 128, %s22_s10, [#allocation4]  }
  0x13   :  { %s175_s25 = scalar_lea.hbm %s284_s1, 128 }
  0x14   :  { %p176_p8 = scmp.ne.s32.totalorder %s284_s1, %s175_s25  ;;  %p179_p9 = scmp.lt.u32.totalorder %s175_s25, %s284_s1 }
  0x16   :  { %p181_p10 = pnand %p179_p9, %p176_p8 }
  0x18   :  { %184 = shalt.err (!%p181_p10)
}
  0x19   :  { %s185_s30 = scalar_lea.vmem %s37_s12, 128  ;;  %p190_p12 = scmp.lt.s32.totalorder %s37_s12, %s37_s12 }
  0x1a   :  { %p186_p11 = scmp.ne.s32.totalorder %s37_s12, %s185_s30  ;;  %p191_p13 = scmp.lt.s32.totalorder %s185_s30, %s185_s30 }
  0x1c   :  { %p192_p0 = por %p191_p13, %p190_p12 }
  0x1e   :  { %p193_p1 = pnand %p192_p0, %p186_p11 }
  0x20   :  { %196 = shalt.err (!%p193_p1)
}
  0x21   :  { %39 = dma.hbm_to_vmem [thread:$0]  %s284_s1, 128, %s37_s12, [#allocation7]  }
  0x22   :  { %219 = dma.done.wait [#allocation4], 128  }
  0x23   :  { %220 = vsyncadd [#allocation4], 4294967168 }
  0x24   :  { %221 = dma.done.wait [#allocation7], 128  }
  0x25   :  { %222 = vsyncadd [#allocation7], 4294967168  ;;  %v58_v0 = vld [vmem:[#allocation3] sm:$0xff]  ;;  %v59_v1 = vld [vmem:[#allocation6] sm:$0xff]  ;;  %vm56_vm1 = vcmask 7168   ;;  %v227_v11 = vmov 0.0  }
  0x26   :  { %67 = vmax.xlane.f32.xlu0 %v58_v0  ;;  %vm79_vm0 = vcmp.gt.f32.partialorder %v59_v1, 0.0  ;;  %57 = vst.msk [vmem:[#allocation2] sm:$0xff] %vm56_vm1, %v227_v11  ;;  %s228_s1 = smov [#allocation8]   ;;  %vm115_vm2 = vcmask 0  }
  0x27   :  { %v80_v2 = vsel %vm79_vm0, %v59_v1, 1.0  ;;  %s123_s4 = sshll.u32 %s228_s1, 4  ;;  %s124_s4 = int_to_ptr.vmem [resolvable:$true] %s123_s4 }
  0x28   :  { %143 = vlog2.f32 %v80_v2  ;;  %s197_s7 = scalar_lea.vmem %s124_s4, 16  ;;  %s201_s8 = scalar_lea.vmem %s124_s4, 32 }
  0x29   :  { %p198_p2 = scmp.ne.s32.totalorder %s124_s4, %s197_s7  ;;  %p202_p3 = scmp.lt.s32.totalorder %s124_s4, %s124_s4 }
  0x2a   :  { %76 = vadd.xlane.f32.xlu0 %v59_v1  ;;  %p203_p4 = scmp.lt.s32.totalorder %s201_s8, %s197_s7 }
  0x2c   :  { %p204_p5 = por %p203_p4, %p202_p3 }
  0x2d   :  { %v94_v23 = vld [vmem:[#allocation2] sm:$0xff] }
  0x2e   :  { %p205_p6 = pnand %p204_p5, %p198_p2 }
  0x32   :  { %v144_v6 = vpop.eup %143 }
  0x33   :  { %v82_v7 = vmul.f32 0.6931472, %v144_v6 }
  0x35   :  { %v83_v8 = vsub.f32 %v82_v7, %v58_v0 }
  0x37   :  { %v84_v10 = vmul.f32 %v83_v8, %v59_v1 }
  0xb3   :  { %v68_v3 = vpop.xlane.xlu0 %67 }
  0xb4   :  { %v69_v4 = vsub.f32 %v58_v0, %v68_v3 }
  0xb6   :  { %v70_v5 = vmul.f32 1.442695, %v69_v4 }
  0xb7   :  { %v77_v12 = vpop.xlane.xlu0 %76 }
  0xb8   :  { %145 = vpow2.f32 %v70_v5 }
  0xb9   :  { %147 = vlog2.f32 %v77_v12 }
  0xba   :  { %149 = vrcp.f32 %v77_v12 }
  0xc2   :  { %v146_v9 = vpop.eup %145 }
  0xc3   :  { %72 = vadd.xlane.f32.xlu1 %v146_v9  ;;  %v148_v14 = vpop.eup %147 }
  0xc4   :  { %v150_v15 = vpop.eup %149  ;;  %v90_v16 = vmul.f32 0.6931472, %v148_v14 }
  0xc7   :  { %85 = vadd.xlane.f32.xlu1 %v84_v10 }
 0x150   :  { %v73_v13 = vpop.xlane.xlu1 %72 }
 0x151   :  { %151 = vlog2.f32 %v73_v13 }
 0x154   :  { %v86_v17 = vpop.xlane.xlu1 %85 }
 0x155   :  { %v88_v18 = vmul.f32 %v150_v15, %v86_v17 }
 0x157   :  { %v91_v19 = vsub.f32 %v88_v18, %v90_v16 }
 0x159   :  { %v92_v22 = vadd.f32 %v91_v19, %v68_v3 }
 0x15b   :  { %v152_v20 = vpop.eup %151 }
 0x15c   :  { %v75_v21 = vmul.f32 0.6931472, %v152_v20 }
 0x15e   :  { %v93_v24 = vadd.f32 %v92_v22, %v75_v21 }
 0x160   :  { %v96_v25 = vadd.f32 %v94_v23, %v93_v24 }
 0x162   :  { %98 = vst.msk [vmem:[#allocation2] sm:$0xff] %vm56_vm1, %v96_v25 }
 0x169   :  { %v102_v26 = vld [vmem:[#allocation2] sm:$0xff] }
 0x16a   :  { %v103_v27 = vsel %vm56_vm1, %v102_v26, 0.0 }
 0x16b   :  { %104 = vadd.xlane.f32.xlu0 %v103_v27 }
 0x1f8   :  { %v105_v28 = vpop.xlane.xlu0 %104 }
 0x1f9   :  { %v106_v29 = vrot.slane %v105_v28, 4 }
 0x1fb   :  { %v107_v30 = vadd.f32 %v106_v29, %v105_v28 }
 0x1fd   :  { %v108_v31 = vrot.slane %v107_v30, 2 }
 0x1ff   :  { %v109_v32 = vadd.f32 %v108_v31, %v107_v30 }
 0x201   :  { %v110_v33 = vrot.slane %v109_v32, 1 }
 0x203   :  { %v111_v34 = vadd.f32 %v110_v33, %v109_v32 }
 0x205   :  { %137 = vpush %v111_v34 }
 0x236   :  { %s138_s5 = spop %137 }
 0x237   :  { %s113_s6 = smul.f32 0.0625, %s138_s5 }
 0x239   :  { %v114_v35 = vstv %s113_s6 }
 0x23a   :  { %116 = vst.msk [vmem:[#allocation8] sm:$0x1] %vm115_vm2, %v114_v35 }
 0x23b   :  { %208 = shalt.err (!%p205_p6)
}
 0x23c   :  { %s209_s11 = scalar_lea.hbm %s285_s2, 16 }
 0x23d   :  { %p210_p7 = scmp.ne.s32.totalorder %s285_s2, %s209_s11  ;;  %p213_p8 = scmp.lt.u32.totalorder %s209_s11, %s285_s2 }
 0x23f   :  { %p215_p9 = pnand %p213_p8, %p210_p7 }
 0x241   :  { %218 = shalt.err (!%p215_p9)
}
 0x242   :  { %126 = dma.vmem_to_hbm [thread:$0]  %s124_s4, 16, %s285_s2, [#allocation5]  }
 0x243   :  { %223 = dma.done.wait [#allocation5], 16  }
 0x244   :  { %224 = vsyncadd [#allocation5], 4294967280 }
 0x245   :  { %130 = vsyncpa [#allocation4], 1 }
 0x246   :  { %131 = vsyncpa [#allocation7], 1 }
 0x247   :  { %132 = vsyncpa [#allocation5], 1 }

</bundles_post_ra>
